<compile_context>
chip_gen: v7x
topology: tpu7x:2x2x1
jax: 0.10.0
libtpu: 0.0.40
codegen_flags: <defaults>
</compile_context>

<pallas_src>
import jax
import jax.numpy as jnp
from jax.experimental import pallas as pl
from jax.experimental.pallas import tpu as pltpu


def _reduce_kernel(x_ref, out_ref):
    # x_ref block: (C, B, tile_hw). C is non-minor, so the fold below is pure VPU.
    x = x_ref[...]
    c = x.shape[0]
    x0 = x[0]
    s = x0
    p = x0
    mx = x0
    mn = x0
    # Static unroll over channels (C is small here).
    # TODO(synk): for large C, tile C as a trailing "arbitrary" grid axis with
    # VMEM scratch accumulators (init 0 / 1 / -inf / +inf via pl.when).
    for i in range(1, c):
        xi = x[i]
        s = s + xi
        p = p * xi
        mx = jnp.maximum(mx, xi)
        mn = jnp.minimum(mn, xi)
    # Single packed, lane-dense output store.
    out_ref[0] = s + 1.0          # torch loop adds 1 to every batch row of the sum
    out_ref[1] = p
    out_ref[2] = mx
    out_ref[3] = mn
    out_ref[4] = s * (1.0 / c)    # mean = sum / C (sum reused, no second reduction)


def _pick_hw_tile(hw, cap=2048):
    """Largest lane-dense (multiple-of-128) tile that divides hw, capped for VMEM."""
    if hw % 128 != 0:
        return hw  # full-extent block: exempt from the (8,128) divisibility rule
    tile = min(hw, cap)
    tile -= tile % 128
    while hw % tile != 0:
        tile -= 128
    return tile


def pt_module_forward(x):
    B, C, H, W = x.shape
    HW = H * W
    # Layout plumbing in the wrapper: spatial axis flattened and placed last
    # (lane-dense), reduction axis C moved to the front (non-minor).
    xt = jnp.transpose(x.reshape(B, C, HW), (1, 0, 2))  # (C, B, HW)

    tile = _pick_hw_tile(HW)
    grid = (HW // tile,)

    out = pl.pallas_call(
        _reduce_kernel,
        out_shape=jax.ShapeDtypeStruct((5, B, HW), x.dtype),
        grid=grid,
        in_specs=[pl.BlockSpec((C, B, tile), lambda j: (0, 0, j))],
        out_specs=pl.BlockSpec((5, B, tile), lambda j: (0, 0, j)),
        compiler_params=pltpu.CompilerParams(
            dimension_semantics=("parallel",)),
    )(xt)

    out = out.reshape(5, B, H, W)
    return out[0], out[1], out[2], out[3], out[4]


if __name__ == "__main__":
    key = jax.random.PRNGKey(0)
    B, C, H, W = 2, 4, 16, 16
    x = jax.random.normal(key, (B, C, H, W), dtype=jnp.float32)

    outs = pt_module_forward(x)
    outs = jax.block_until_ready(outs)

    # correctness check against plain-JAX reference
    ref = (
        jnp.sum(x, axis=1) + 1.0,
        jnp.prod(x, axis=1),
        jnp.max(x, axis=1),
        jnp.min(x, axis=1),
        jnp.mean(x, axis=1),
    )
    for o, r in zip(outs, ref):
        assert o.shape == (B, H, W)
        assert jnp.allclose(o, r, atol=1e-5, rtol=1e-5)

    print("KERNEL_OK")
</pallas_src>

<mosaic_0001>
module attributes {stable_mosaic.version = 11 : i64} {
  func.func @_reduce_kernel(%arg0: i32, %arg1: memref<4x2x256xf32, #tpu.memory_space<vmem>>, %arg2: memref<5x2x256xf32, #tpu.memory_space<vmem>>) attributes {dimension_semantics = [#tpu.dimension_semantics<parallel>], iteration_bounds = array<i64: 1>, scalar_prefetch = 0 : i64, scratch_operands = 0 : i64, tpu.core_type = #tpu.core_type<tc>, window_params = [{transform_indices = @transform_0, window_bounds = array<i64: 4, 2, 256>}, {transform_indices = @transform_1, window_bounds = array<i64: 5, 2, 256>}]} {
    %c0 = arith.constant 0 : index
    %c0_0 = arith.constant 0 : index
    %c0_1 = arith.constant 0 : index
    %0 = vector.load %arg1[%c0, %c0_0, %c0_1] : memref<4x2x256xf32, #tpu.memory_space<vmem>>, vector<4x2x256xf32>
    %1 = vector.extract_strided_slice %0 {offsets = [0, 0, 0], sizes = [1, 2, 256], strides = [1, 1, 1]} : vector<4x2x256xf32> to vector<1x2x256xf32>
    %2 = vector.shape_cast %1 : vector<1x2x256xf32> to vector<2x256xf32>
    %3 = vector.extract_strided_slice %0 {offsets = [1, 0, 0], sizes = [1, 2, 256], strides = [1, 1, 1]} : vector<4x2x256xf32> to vector<1x2x256xf32>
    %4 = vector.shape_cast %3 : vector<1x2x256xf32> to vector<2x256xf32>
    %5 = arith.addf %2, %4 : vector<2x256xf32>
    %6 = arith.mulf %2, %4 : vector<2x256xf32>
    %7 = arith.maximumf %2, %4 : vector<2x256xf32>
    %8 = arith.minimumf %2, %4 : vector<2x256xf32>
    %9 = vector.extract_strided_slice %0 {offsets = [2, 0, 0], sizes = [1, 2, 256], strides = [1, 1, 1]} : vector<4x2x256xf32> to vector<1x2x256xf32>
    %10 = vector.shape_cast %9 : vector<1x2x256xf32> to vector<2x256xf32>
    %11 = arith.addf %5, %10 : vector<2x256xf32>
    %12 = arith.mulf %6, %10 : vector<2x256xf32>
    %13 = arith.maximumf %7, %10 : vector<2x256xf32>
    %14 = arith.minimumf %8, %10 : vector<2x256xf32>
    %15 = vector.extract_strided_slice %0 {offsets = [3, 0, 0], sizes = [1, 2, 256], strides = [1, 1, 1]} : vector<4x2x256xf32> to vector<1x2x256xf32>
    %16 = vector.shape_cast %15 : vector<1x2x256xf32> to vector<2x256xf32>
    %17 = arith.addf %11, %16 : vector<2x256xf32>
    %18 = arith.mulf %12, %16 : vector<2x256xf32>
    %19 = arith.maximumf %13, %16 : vector<2x256xf32>
    %20 = arith.minimumf %14, %16 : vector<2x256xf32>
    %cst = arith.constant 1.000000e+00 : f32
    %21 = vector.broadcast %cst : f32 to vector<2x256xf32>
    %22 = arith.addf %17, %21 : vector<2x256xf32>
    %c0_2 = arith.constant 0 : index
    %c0_3 = arith.constant 0 : index
    %c0_4 = arith.constant 0 : index
    %23 = vector.load %arg2[%c0_2, %c0_3, %c0_4] : memref<5x2x256xf32, #tpu.memory_space<vmem>>, vector<1x2x256xf32>
    %24 = vector.shape_cast %23 : vector<1x2x256xf32> to vector<2x256xf32>
    %25 = vector.shape_cast %22 : vector<2x256xf32> to vector<1x2x256xf32>
    tpu.vector_store %arg2[%c0_2, %c0_3, %c0_4], %25 {strides = array<i32>} : memref<5x2x256xf32, #tpu.memory_space<vmem>>, vector<1x2x256xf32>,
    %c1 = arith.constant 1 : index
    %c0_5 = arith.constant 0 : index
    %c0_6 = arith.constant 0 : index
    %26 = vector.load %arg2[%c1, %c0_5, %c0_6] : memref<5x2x256xf32, #tpu.memory_space<vmem>>, vector<1x2x256xf32>
    %27 = vector.shape_cast %26 : vector<1x2x256xf32> to vector<2x256xf32>
    %28 = vector.shape_cast %18 : vector<2x256xf32> to vector<1x2x256xf32>
    tpu.vector_store %arg2[%c1, %c0_5, %c0_6], %28 {strides = array<i32>} : memref<5x2x256xf32, #tpu.memory_space<vmem>>, vector<1x2x256xf32>,
    %c2 = arith.constant 2 : index
    %c0_7 = arith.constant 0 : index
    %c0_8 = arith.constant 0 : index
    %29 = vector.load %arg2[%c2, %c0_7, %c0_8] : memref<5x2x256xf32, #tpu.memory_space<vmem>>, vector<1x2x256xf32>
    %30 = vector.shape_cast %29 : vector<1x2x256xf32> to vector<2x256xf32>
    %31 = vector.shape_cast %19 : vector<2x256xf32> to vector<1x2x256xf32>
    tpu.vector_store %arg2[%c2, %c0_7, %c0_8], %31 {strides = array<i32>} : memref<5x2x256xf32, #tpu.memory_space<vmem>>, vector<1x2x256xf32>,
    %c3 = arith.constant 3 : index
    %c0_9 = arith.constant 0 : index
    %c0_10 = arith.constant 0 : index
    %32 = vector.load %arg2[%c3, %c0_9, %c0_10] : memref<5x2x256xf32, #tpu.memory_space<vmem>>, vector<1x2x256xf32>
    %33 = vector.shape_cast %32 : vector<1x2x256xf32> to vector<2x256xf32>
    %34 = vector.shape_cast %20 : vector<2x256xf32> to vector<1x2x256xf32>
    tpu.vector_store %arg2[%c3, %c0_9, %c0_10], %34 {strides = array<i32>} : memref<5x2x256xf32, #tpu.memory_space<vmem>>, vector<1x2x256xf32>,
    %cst_11 = arith.constant 2.500000e-01 : f32
    %35 = vector.broadcast %cst_11 : f32 to vector<2x256xf32>
    %36 = arith.mulf %17, %35 : vector<2x256xf32>
    %c4 = arith.constant 4 : index
    %c0_12 = arith.constant 0 : index
    %c0_13 = arith.constant 0 : index
    %37 = vector.load %arg2[%c4, %c0_12, %c0_13] : memref<5x2x256xf32, #tpu.memory_space<vmem>>, vector<1x2x256xf32>
    %38 = vector.shape_cast %37 : vector<1x2x256xf32> to vector<2x256xf32>
    %39 = vector.shape_cast %36 : vector<2x256xf32> to vector<1x2x256xf32>
    tpu.vector_store %arg2[%c4, %c0_12, %c0_13], %39 {strides = array<i32>} : memref<5x2x256xf32, #tpu.memory_space<vmem>>, vector<1x2x256xf32>,
    return
  }
  func.func @transform_0(%arg0: i32) -> (i32, i32, i32) {
    %c0_i32 = arith.constant 0 : i32
    %c0_i32_0 = arith.constant 0 : i32
    %c0_i32_1 = arith.constant 0 : i32
    return %c0_i32, %c0_i32_0, %arg0 : i32, i32, i32
  }
  func.func @transform_1(%arg0: i32) -> (i32, i32, i32) {
    %c0_i32 = arith.constant 0 : i32
    %c0_i32_0 = arith.constant 0 : i32
    %c0_i32_1 = arith.constant 0 : i32
    return %c0_i32, %c0_i32_0, %arg0 : i32, i32, i32
  }
}

</mosaic_0001>

<bundles_post_ra>
// kernel: tpu_custom_call.1
= control target key start
LH: loop header
LB: loop body
LE: loop exit
PB: predicated region body
PF: predicated region fallthrough
CT: control target
= control target key end

     0   :  { %6 = vsyncpa [#allocation3], 0  ;;  %s163_s0 = inlined_call_operand.hbm [shape: f32[4,2,256], index: 0, kind: input, shape index: {}]   ;;  %s164_s1 = inlined_call_operand.hbm [shape: f32[5,2,256], index: 1, kind: output, shape index: {}]  }
   0x1   :  { %7 = vsyncpa [#allocation4], 0  ;;  %s119_s6 = smov [#allocation2]   ;;  %s71_s10 = scalar_lea.hbm %s163_s0, 256 }
   0x2   :  { %s13_s7 = sshll.u32 %s119_s6, 4  ;;  %p72_p0 = scmp.ne.s32.totalorder %s163_s0, %s71_s10  ;;  %s14_s7 = int_to_ptr.vmem [resolvable:$true] %s13_s7 }
   0x3   :  { %p75_p1 = scmp.lt.u32.totalorder %s71_s10, %s163_s0 }
   0x5   :  { %p77_p2 = pnand %p75_p1, %p72_p0 }
   0x7   :  { %80 = shalt.err (!%p77_p2)
}
   0x8   :  { %s81_s15 = scalar_lea.vmem %s14_s7, 256  ;;  %p86_p4 = scmp.lt.s32.totalorder %s14_s7, %s14_s7 }
   0x9   :  { %p82_p3 = scmp.ne.s32.totalorder %s14_s7, %s81_s15  ;;  %p87_p5 = scmp.lt.s32.totalorder %s81_s15, %s81_s15 }
   0xb   :  { %p88_p6 = por %p87_p5, %p86_p4 }
   0xd   :  { %p89_p7 = pnand %p88_p6, %p82_p3 }
   0xf   :  { %92 = shalt.err (!%p89_p7)
}
  0x10   :  { %s120_s16 = smov 64   ;;  %s121_s17 = smov 4  }
  0x11   :  { %19 = dma.hbm_to_vmem [thread:$0]  %s163_s0, 256, %s14_s7, [#allocation3], %s120_s16, %s120_s16, %s121_s17  }
  0x12   :  { %115 = dma.done.wait [#allocation3], 256  }
  0x13   :  { %116 = vsyncadd [#allocation3], 4294967040  ;;  %v23_v0 = vld [vmem:[#allocation2] sm:$0xf]  ;;  %v24_v1 = vld [vmem:[#allocation2 + $0x4] sm:$0xf] }
  0x14   :  { %v25_v2 = vld [vmem:[#allocation2 + $0x8] sm:$0xf]  ;;  %v27_v3 = vadd.f32 %v24_v1, %v23_v0  ;;  %v28_v4 = vmul.f32 %v24_v1, %v23_v0  ;;  %v29_v5 = vmax.f32 %v23_v0, %v24_v1  ;;  %v30_v6 = vmin.f32 %v23_v0, %v24_v1  ;;  %v26_v7 = vld [vmem:[#allocation2 + $0xc] sm:$0xf]  ;;  %s122_s20 = smov [#allocation5]  }
  0x15   :  { %s55_s21 = sshll.u32 %s122_s20, 4  ;;  %s56_s21 = int_to_ptr.vmem [resolvable:$true] %s55_s21 }
  0x16   :  { %v31_v8 = vadd.f32 %v27_v3, %v25_v2  ;;  %v32_v9 = vmul.f32 %v28_v4, %v25_v2  ;;  %v33_v10 = vmax.f32 %v29_v5, %v25_v2  ;;  %v34_v11 = vmin.f32 %v30_v6, %v25_v2  ;;  %s93_s0 = scalar_lea.vmem %s56_s21, 320  ;;  %p98_p9 = scmp.lt.s32.totalorder %s56_s21, %s56_s21 }
  0x17   :  { %p94_p8 = scmp.ne.s32.totalorder %s56_s21, %s93_s0  ;;  %p99_p10 = scmp.lt.s32.totalorder %s93_s0, %s93_s0 }
  0x18   :  { %v35_v12 = vadd.f32 %v31_v8, %v26_v7  ;;  %v36_v13 = vmul.f32 %v32_v9, %v26_v7  ;;  %v37_v14 = vmax.f32 %v33_v10, %v26_v7  ;;  %v38_v15 = vmin.f32 %v34_v11, %v26_v7 }
  0x19   :  { %p100_p11 = por %p99_p10, %p98_p9 }
  0x1a   :  { %v39_v16 = vadd.f32 1.0, %v35_v12  ;;  %42 = vst [vmem:[#allocation5 + $0x4] sm:$0xf] %v36_v13  ;;  %44 = vst [vmem:[#allocation5 + $0x8] sm:$0xf] %v37_v14  ;;  %v47_v17 = vmul.f32 0.25, %v35_v12 }
  0x1b   :  { %46 = vst [vmem:[#allocation5 + $0xc] sm:$0xf] %v38_v15  ;;  %p101_p12 = pnand %p100_p11, %p94_p8 }
  0x1c   :  { %40 = vst [vmem:[#allocation5] sm:$0xf] %v39_v16  ;;  %49 = vst [vmem:[#allocation5 + $0x10] sm:$0xf] %v47_v17 }
  0x1d   :  { %104 = shalt.err (!%p101_p12)
}
  0x1e   :  { %s105_s24 = scalar_lea.hbm %s164_s1, 320 }
  0x1f   :  { %p106_p13 = scmp.ne.s32.totalorder %s164_s1, %s105_s24  ;;  %p109_p0 = scmp.lt.u32.totalorder %s105_s24, %s164_s1 }
  0x21   :  { %p111_p1 = pnand %p109_p0, %p106_p13 }
  0x23   :  { %114 = shalt.err (!%p111_p1)
}
  0x24   :  { %61 = dma.vmem_to_hbm [thread:$0]  %s56_s21, 320, %s164_s1, [#allocation4], %s120_s16, %s120_s16, %s121_s17  }
  0x25   :  { %117 = dma.done.wait [#allocation4], 320  }
  0x26   :  { %118 = vsyncadd [#allocation4], 4294966976 }
  0x27   :  { %65 = vsyncpa [#allocation3], 1 }
  0x28   :  { %66 = vsyncpa [#allocation4], 1 }

</bundles_post_ra>
